<compile_context>
chip_gen: v7x
topology: tpu7x:2x2x1
jax: 0.10.0
libtpu: 0.0.40
codegen_flags: <defaults>
</compile_context>

<pallas_src>
import functools

import jax
import jax.numpy as jnp
from jax.experimental import pallas as pl
from jax.experimental.pallas import tpu as pltpu


def _pixel_unshuffle_kernel(x_ref, o_ref, xt_ref, *, scale, h_blk, w):
    # x_ref : (c_blk, h_blk*scale, W)        input rows for this tile
    # o_ref : (c_blk, scale*scale, h_blk, w) unshuffled output tile
    # xt_ref: (c_blk, W, h_blk)              VMEM scratch (transposed row-slice)
    for sh in range(scale):
        # Rows i*scale + sh of the tile: sublane-strided load, lanes stay W wide.
        x_sh = x_ref[:, pl.ds(sh, h_blk, stride=scale), :]          # (c_blk, h_blk, W)
        # One lane<->sublane transpose so the column split becomes a sublane stride.
        xt_ref[...] = jnp.transpose(x_sh, (0, 2, 1))                # (c_blk, W, h_blk)
        for sw in range(scale):
            cols = xt_ref[:, pl.ds(sw, w, stride=scale), :]         # (c_blk, w, h_blk)
            o_ref[:, sh * scale + sw, :, :] = jnp.transpose(cols, (0, 2, 1))


def _choose_blocks(bc, H, W, scale, itemsize, target_tile_bytes):
    """Pick (c_blk, rows_blk) for input tiles (c_blk, rows_blk, W).

    rows_blk divides H, is a multiple of `scale`, and (rows_blk and
    rows_blk//scale) are either full extents or multiples of the sublane
    packing, so both the input and output BlockSpecs satisfy the (8,128) rule.
    c_blk divides bc (outermost dim: no tiling constraint).
    Preference: largest tile <= target_tile_bytes, then >= 2 total grid steps
    so the "parallel" axes actually shard across v7x's two TensorCores.
    """
    sub = 8 * max(1, 4 // max(1, itemsize))   # 8 f32, 16 bf16, 32 int8/fp8
    h = H // scale

    def rows_ok(r):
        if r == H:
            return True
        hb = r // scale
        return (r % scale == 0) and (r % sub == 0) and (hb == h or hb % sub == 0)

    row_cands = sorted({r for r in range(1, H + 1) if H % r == 0 and rows_ok(r)})
    row_bytes = W * itemsize

    fitting_r = [r for r in row_cands if r * row_bytes <= target_tile_bytes]
    rows_blk = max(fitting_r) if fitting_r else min(row_cands)

    c_divs = [d for d in range(1, bc + 1) if bc % d == 0]
    fitting_c = [d for d in c_divs if d * rows_blk * row_bytes <= target_tile_bytes]
    c_blk = max(fitting_c) if fitting_c else 1

    # Guarantee >= 2 grid steps when possible (megacore sharding on v7x).
    if (bc // c_blk) * (H // rows_blk) < 2:
        if c_blk > 1:
            c_blk = max(d for d in c_divs if d < c_blk)
        elif rows_blk == H and len(row_cands) > 1:
            rows_blk = max(r for r in row_cands if r < H)
    return c_blk, rows_blk


def pixel_unshuffle(x, scale, *, target_tile_bytes=4 << 20):
    b, c, H, W = x.shape
    if scale == 1:
        return x
    assert H % scale == 0 and W % scale == 0, "spatial dims must be divisible by scale"
    h, w = H // scale, W // scale
    bc = b * c
    itemsize = jnp.dtype(x.dtype).itemsize

    c_blk, rows_blk = _choose_blocks(bc, H, W, scale, itemsize, target_tile_bytes)
    h_blk = rows_blk // scale
    n_c, n_r = bc // c_blk, H // rows_blk

    kernel = functools.partial(
        _pixel_unshuffle_kernel, scale=scale, h_blk=h_blk, w=w
    )

    x3 = x.reshape(bc, H, W)   # free view: one (batch, channel) plane per row

    out4 = pl.pallas_call(
        kernel,
        out_shape=jax.ShapeDtypeStruct((bc, scale * scale, h, w), x.dtype),
        grid=(n_c, n_r),
        in_specs=[pl.BlockSpec((c_blk, rows_blk, W), lambda ci, ri: (ci, ri, 0))],
        out_specs=pl.BlockSpec(
            (c_blk, scale * scale, h_blk, w), lambda ci, ri: (ci, 0, ri, 0)
        ),
        scratch_shapes=[pltpu.VMEM((c_blk, W, h_blk), x.dtype)],
        compiler_params=pltpu.CompilerParams(
            dimension_semantics=("parallel", "parallel"),
            # Explicit limit: v5e's scoped default is ~16 MiB; 48 MiB fits under
            # v7x's 64 MiB physical VMEM and leaves room for 2x(in+out) buffers
            # plus the transpose scratch at ~4 MiB tiles.
            vmem_limit_bytes=48 * 1024 * 1024,
        ),
        cost_estimate=pl.CostEstimate(
            flops=0, transcendentals=0, bytes_accessed=2 * bc * H * W * itemsize
        ),
    )(x3)

    # Free reshape: (bc, s^2, h, w) row-major == (b, c*s^2, h, w) row-major.
    return out4.reshape(b, c * scale * scale, h, w)


def _pixel_unshuffle_ref(x, scale):
    # Pure-JAX reference replicating torch.nn.functional.pixel_unshuffle.
    b, c, H, W = x.shape
    h, w = H // scale, W // scale
    x = x.reshape(b, c, h, scale, w, scale)
    x = jnp.transpose(x, (0, 1, 3, 5, 2, 4))
    return x.reshape(b, c * scale * scale, h, w)


if __name__ == "__main__":
    key = jax.random.PRNGKey(0)

    # Primary case: scale=2, f32, (2, 4, 16, 16) -> (2, 16, 8, 8).
    scale = 2
    x = jax.random.normal(key, (2, 4, 16, 16), dtype=jnp.float32)
    out = jax.block_until_ready(pixel_unshuffle(x, scale))
    ref = _pixel_unshuffle_ref(x, scale)
    assert out.shape == (2, 4 * scale * scale, 8, 8), out.shape
    assert jnp.array_equal(out, ref), "mismatch vs reference (scale=2, f32)"

    # Non-square spatial dims, bc=3 (single-channel blocks), scale=2.
    x2 = jax.random.normal(jax.random.PRNGKey(0), (1, 3, 12, 8), dtype=jnp.float32)
    out2 = jax.block_until_ready(pixel_unshuffle(x2, 2))
    assert jnp.array_equal(out2, _pixel_unshuffle_ref(x2, 2)), "mismatch (non-square)"

    print("KERNEL_OK")
</pallas_src>

<mosaic_0001>
module attributes {stable_mosaic.version = 11 : i64} {
  func.func @_pixel_unshuffle_kernel(%arg0: i32, %arg1: i32, %arg2: memref<4x16x16xf32, #tpu.memory_space<vmem>>, %arg3: memref<4x4x8x8xf32, #tpu.memory_space<vmem>>, %arg4: memref<4x16x8xf32, #tpu.memory_space<vmem>>) attributes {dimension_semantics = [#tpu.dimension_semantics<parallel>, #tpu.dimension_semantics<parallel>], iteration_bounds = array<i64: 2, 1>, scalar_prefetch = 0 : i64, scratch_operands = 1 : i64, tpu.core_type = #tpu.core_type<tc>, window_params = [{transform_indices = @transform_0, window_bounds = array<i64: 4, 16, 16>}, {transform_indices = @transform_1, window_bounds = array<i64: 4, 4, 8, 8>}]} {
    %c0 = arith.constant 0 : index
    %c0_0 = arith.constant 0 : index
    %c0_1 = arith.constant 0 : index
    %0 = tpu.strided_load %arg2[%c0, %c0_0, %c0_1] {strides = array<i32: 1, 2, 1>} : memref<4x16x16xf32, #tpu.memory_space<vmem>>, vector<4x8x16xf32>
    %1 = tpu.transpose %0, [0, 2, 1] : vector<4x8x16xf32> -> vector<4x16x8xf32>
    %c0_2 = arith.constant 0 : index
    %c0_3 = arith.constant 0 : index
    %c0_4 = arith.constant 0 : index
    %2 = vector.load %arg4[%c0_2, %c0_3, %c0_4] : memref<4x16x8xf32, #tpu.memory_space<vmem>>, vector<4x16x8xf32>
    tpu.vector_store %arg4[%c0_2, %c0_3, %c0_4], %1 {strides = array<i32>} : memref<4x16x8xf32, #tpu.memory_space<vmem>>, vector<4x16x8xf32>,
    %c0_5 = arith.constant 0 : index
    %c0_6 = arith.constant 0 : index
    %c0_7 = arith.constant 0 : index
    %3 = tpu.strided_load %arg4[%c0_5, %c0_6, %c0_7] {strides = array<i32: 1, 2, 1>} : memref<4x16x8xf32, #tpu.memory_space<vmem>>, vector<4x8x8xf32>
    %4 = tpu.transpose %3, [0, 2, 1] : vector<4x8x8xf32> -> vector<4x8x8xf32>
    %c0_8 = arith.constant 0 : index
    %c0_9 = arith.constant 0 : index
    %c0_10 = arith.constant 0 : index
    %c0_11 = arith.constant 0 : index
    %5 = vector.load %arg3[%c0_8, %c0_9, %c0_10, %c0_11] : memref<4x4x8x8xf32, #tpu.memory_space<vmem>>, vector<4x1x8x8xf32>
    %6 = vector.shape_cast %5 : vector<4x1x8x8xf32> to vector<4x8x8xf32>
    %7 = vector.shape_cast %4 : vector<4x8x8xf32> to vector<4x1x8x8xf32>
    tpu.vector_store %arg3[%c0_8, %c0_9, %c0_10, %c0_11], %7 {strides = array<i32>} : memref<4x4x8x8xf32, #tpu.memory_space<vmem>>, vector<4x1x8x8xf32>,
    %c0_12 = arith.constant 0 : index
    %c1 = arith.constant 1 : index
    %c0_13 = arith.constant 0 : index
    %8 = tpu.strided_load %arg4[%c0_12, %c1, %c0_13] {strides = array<i32: 1, 2, 1>} : memref<4x16x8xf32, #tpu.memory_space<vmem>>, vector<4x8x8xf32>
    %9 = tpu.transpose %8, [0, 2, 1] : vector<4x8x8xf32> -> vector<4x8x8xf32>
    %c0_14 = arith.constant 0 : index
    %c1_15 = arith.constant 1 : index
    %c0_16 = arith.constant 0 : index
    %c0_17 = arith.constant 0 : index
    %10 = vector.load %arg3[%c0_14, %c1_15, %c0_16, %c0_17] : memref<4x4x8x8xf32, #tpu.memory_space<vmem>>, vector<4x1x8x8xf32>
    %11 = vector.shape_cast %10 : vector<4x1x8x8xf32> to vector<4x8x8xf32>
    %12 = vector.shape_cast %9 : vector<4x8x8xf32> to vector<4x1x8x8xf32>
    tpu.vector_store %arg3[%c0_14, %c1_15, %c0_16, %c0_17], %12 {strides = array<i32>} : memref<4x4x8x8xf32, #tpu.memory_space<vmem>>, vector<4x1x8x8xf32>,
    %c0_18 = arith.constant 0 : index
    %c1_19 = arith.constant 1 : index
    %c0_20 = arith.constant 0 : index
    %13 = tpu.strided_load %arg2[%c0_18, %c1_19, %c0_20] {strides = array<i32: 1, 2, 1>} : memref<4x16x16xf32, #tpu.memory_space<vmem>>, vector<4x8x16xf32>
    %14 = tpu.transpose %13, [0, 2, 1] : vector<4x8x16xf32> -> vector<4x16x8xf32>
    %c0_21 = arith.constant 0 : index
    %c0_22 = arith.constant 0 : index
    %c0_23 = arith.constant 0 : index
    %15 = vector.load %arg4[%c0_21, %c0_22, %c0_23] : memref<4x16x8xf32, #tpu.memory_space<vmem>>, vector<4x16x8xf32>
    tpu.vector_store %arg4[%c0_21, %c0_22, %c0_23], %14 {strides = array<i32>} : memref<4x16x8xf32, #tpu.memory_space<vmem>>, vector<4x16x8xf32>,
    %c0_24 = arith.constant 0 : index
    %c0_25 = arith.constant 0 : index
    %c0_26 = arith.constant 0 : index
    %16 = tpu.strided_load %arg4[%c0_24, %c0_25, %c0_26] {strides = array<i32: 1, 2, 1>} : memref<4x16x8xf32, #tpu.memory_space<vmem>>, vector<4x8x8xf32>
    %17 = tpu.transpose %16, [0, 2, 1] : vector<4x8x8xf32> -> vector<4x8x8xf32>
    %c0_27 = arith.constant 0 : index
    %c2 = arith.constant 2 : index
    %c0_28 = arith.constant 0 : index
    %c0_29 = arith.constant 0 : index
    %18 = vector.load %arg3[%c0_27, %c2, %c0_28, %c0_29] : memref<4x4x8x8xf32, #tpu.memory_space<vmem>>, vector<4x1x8x8xf32>
    %19 = vector.shape_cast %18 : vector<4x1x8x8xf32> to vector<4x8x8xf32>
    %20 = vector.shape_cast %17 : vector<4x8x8xf32> to vector<4x1x8x8xf32>
    tpu.vector_store %arg3[%c0_27, %c2, %c0_28, %c0_29], %20 {strides = array<i32>} : memref<4x4x8x8xf32, #tpu.memory_space<vmem>>, vector<4x1x8x8xf32>,
    %c0_30 = arith.constant 0 : index
    %c1_31 = arith.constant 1 : index
    %c0_32 = arith.constant 0 : index
    %21 = tpu.strided_load %arg4[%c0_30, %c1_31, %c0_32] {strides = array<i32: 1, 2, 1>} : memref<4x16x8xf32, #tpu.memory_space<vmem>>, vector<4x8x8xf32>
    %22 = tpu.transpose %21, [0, 2, 1] : vector<4x8x8xf32> -> vector<4x8x8xf32>
    %c0_33 = arith.constant 0 : index
    %c3 = arith.constant 3 : index
    %c0_34 = arith.constant 0 : index
    %c0_35 = arith.constant 0 : index
    %23 = vector.load %arg3[%c0_33, %c3, %c0_34, %c0_35] : memref<4x4x8x8xf32, #tpu.memory_space<vmem>>, vector<4x1x8x8xf32>
    %24 = vector.shape_cast %23 : vector<4x1x8x8xf32> to vector<4x8x8xf32>
    %25 = vector.shape_cast %22 : vector<4x8x8xf32> to vector<4x1x8x8xf32>
    tpu.vector_store %arg3[%c0_33, %c3, %c0_34, %c0_35], %25 {strides = array<i32>} : memref<4x4x8x8xf32, #tpu.memory_space<vmem>>, vector<4x1x8x8xf32>,
    return
  }
  func.func @transform_0(%arg0: i32, %arg1: i32) -> (i32, i32, i32) {
    %c0_i32 = arith.constant 0 : i32
    %c0_i32_0 = arith.constant 0 : i32
    return %arg0, %arg1, %c0_i32 : i32, i32, i32
  }
  func.func @transform_1(%arg0: i32, %arg1: i32) -> (i32, i32, i32, i32) {
    %c0_i32 = arith.constant 0 : i32
    %c0_i32_0 = arith.constant 0 : i32
    %c0_i32_1 = arith.constant 0 : i32
    return %arg0, %c0_i32, %arg1, %c0_i32_0 : i32, i32, i32, i32
  }
}

</mosaic_0001>

<bundles_post_ra>
// kernel: tpu_custom_call.1
= control target key start
LH: loop header
LB: loop body
LE: loop exit
PB: predicated region body
PF: predicated region fallthrough
CT: control target
= control target key end

     0   :  { %6 = vsyncpa [#allocation4], 0  ;;  %s1565_s0 = inlined_call_operand.hbm [shape: f32[8,16,16], index: 0, kind: input, shape index: {}]   ;;  %s1566_s1 = inlined_call_operand.hbm [shape: f32[8,4,8,8], index: 1, kind: output, shape index: {}]  }
   0x1   :  { %8 = vsyncpa [#allocation4 + $0x1], 0 }
   0x2   :  { %9 = vsyncpa [#allocation5], 0 }
   0x3   :  { %11 = vsyncpa [#allocation5 + $0x1], 0  ;;  %s1338_s6 = smov 0   ;;  %s1340_s7 = smov 0  }
   0x4   :  { %s1342_s8 = smov 0   ;;  %s1344_s9 = smov 0  }
   0x5   :  { %s1346_s10 = smov 0   ;;  %s1348_s11 = smov 0  }
   0x6 LB: > { %s1101_s12 = sadd.s32 4294967295, %s1320_s11   ;;  %s1102_s13 = sadd.s32 4294967294, %s1320_s11   ;;  %s1320_s11 = sphi %s1348_s11, %s17_s11   ;;  %s1316_s10 = sphi %s1346_s10, %s1581_s10   ;;  %s1312_s9 = sphi %s1344_s9, %s1580_s9   ;;  %s1308_s8 = sphi %s1342_s8, %s1579_s8   ;;  %s1304_s7 = sphi %s1340_s7, %s1578_s7   ;;  %s1300_s6 = sphi %s1338_s6, %s1577_s6  }
   0x7   : > { %s29_s14 = sadd.s32 1, %s1316_s10  ;;  %s38_s15 = sadd.s32 1, %s1308_s8 }
   0x8   : > { %p31_p0 = scmp.ge.s32.totalorder %s29_s14, 2  ;;  %p45_p1 = scmp.ne.s32.totalorder %s1308_s8, %s1304_s7 }
   0x9   : > { %p46_p2 = scmp.eq.s32.totalorder %s1320_s11, 0  ;;  %p51_p3 = scmp.ne.s32.totalorder %s1304_s7, %s1300_s6 }
   0xa   : > { %s1583_s14 = smov (%p31_p0, %s29_s14), 0  ;;  %p52_p5 = scmp.eq.s32.totalorder %s1101_s12, 0 }
   0xb   : > { %p1379_p4 = por %p46_p2, %p45_p1  ;;  %s33_s17 = ssub.s32 %s1316_s10, %s1583_s14 }
   0xc   : > { %p77_p6 = scmp.eq.s32.totalorder %s1101_s12, 1  ;;  %p36_p7 = scmp.eq.s32.totalorder %s33_s17, 0 }
   0xd   : > { %p1385_p8 = por %p52_p5, %p51_p3  ;;  %p83_p10 = scmp.eq.s32.totalorder %s1102_s13, 1 }
   0xe   : > { %p1389_p9 = por %p77_p6, %p45_p1  ;;  %p1153_p13 = scmp.lt.s32.totalorder %s1320_s11, 2 }
   0xf   : > { %s1394_s20 = scalar_select %p36_p7, %s1308_s8, %s38_s15  }
  0x10   : > { %s1570_s19 = scalar_select %p1389_p9, 1, 0 }
  0x11   : > { %p1396_p11 = por %p83_p10, %p51_p3  ;;  %s103_s22 = sand.u32 1, %s1308_s8  }
  0x12   : > { %s1105_s23 = sshll.u32 %s103_s22, 6  ;;  %s1138_s24 = sshll.u32 %s1316_s10, 10 }
  0x13   : > { %s1571_s21 = scalar_select %p1396_p11, 1, 0 }
  0x14   : > { %s1407_s27 = scalar_lea.hbm %s1565_s0, %s1138_s24  ;;  %s107_s28 = scalar_lea.vmem [#allocation3], %s1105_s23 }
  0x15   : > { %s117_s29 = sshll.u32 %s107_s28, 4  ;;  %p1413_p0 = pnand %p1153_p13, %p1379_p4  ;;  %s1409_s29 = int_to_ptr.vmem [resolvable:$true] %s117_s29 }
  0x16   : > { %s1418_s2 = scalar_lea.sflag [#allocation4], %s103_s22  ;;  %s1208_s3 = scalar_lea.hbm %s1407_s27, 1024 }
  0x17   : > { %p1209_p2 = scmp.ne.s32.totalorder %s1407_s27, %s1208_s3  ;;  %p1210_p3 = pneg %p1413_p0 }
  0x18   : > { %s1213_s12 = scalar_lea.hbm %s1565_s0, 2048  ;;  %p1214_p4 = scmp.lt.u32.totalorder %s1407_s27, %s1565_s0 }
  0x19   : > { %p1211_p5 = pnand %p1210_p3, %p1209_p2  ;;  %p1215_p7 = scmp.lt.u32.totalorder %s1213_s12, %s1208_s3 }
  0x1a   : > { %p1217_p13 = scmp.lt.u32.totalorder %s1208_s3, %s1407_s27 }
  0x1b   : > { %p1212_p6 = pneg %p1211_p5  ;;  %p1216_p10 = por %p1215_p7, %p1214_p4 }
  0x1d   : > { %p1218_p12 = por %p1217_p13, %p1216_p10 }
  0x1f   : > { %p1219_p1 = pnand %p1218_p12, %p1212_p6 }
  0x21   : > { %1222 = shalt.err (!%p1219_p1)
}
  0x22   : > { %s1223_s16 = scalar_lea.vmem %s1409_s29, 1024  ;;  %s1322_s17 = smov [#allocation3]  }
  0x23   : > { %p1224_p2 = scmp.ne.s32.totalorder %s1409_s29, %s1223_s16  ;;  %s1228_s22 = sshll.u32 %s1322_s17, 4  ;;  %s1229_s22 = int_to_ptr.vmem [resolvable:$false] %s1228_s22 }
  0x24   : > { %s1230_s23 = scalar_lea.vmem %s1229_s22, 2048  ;;  %p1231_p9 = scmp.lt.s32.totalorder %s1409_s29, %s1229_s22 }
  0x25   : > { %p1226_p5 = pnand %p1224_p2, %p1210_p3  ;;  %p1232_p4 = scmp.lt.s32.totalorder %s1230_s23, %s1223_s16 }
  0x27   : > { %p1227_p11 = pneg %p1226_p5  ;;  %p1233_p7 = por %p1232_p4, %p1231_p9 }
  0x29   : > { %p1234_p10 = pnand %p1233_p7, %p1227_p11 }
  0x2b   : > { %1237 = shalt.err (!%p1234_p10)
}
  0x2c   : > { %s1323_s24 = smov 128   ;;  %s1324_s25 = smov 8  }
  0x2d   : > { %1148 = dma.hbm_to_vmem [thread:$0]  (!%p1413_p0), %s1407_s27, 1024, %s1409_s29, %s1418_s2, %s1323_s24, %s1323_s24, %s1324_s25  }
  0x2e   : > { %p125_p12 = scmp.lt.s32.totalorder %s1320_s11, 3  ;;  %p1573_p1 = scmp.ge.s32.totalorder %s1320_s11, 1 }
  0x30   : > { %p126_p3 = pnand %p1573_p1, %p125_p12 }
  0x31   : > { %s1450_s26 = sand.u32 (!%p126_p3), 1, %s1304_s7  }
  0x32   : > { %129 = sbr.rel (%p126_p3) target bundleno = 381 (0x17d), region = 24  ;;  %s1110_s28 = sshll.u32 (!%p126_p3), %s1450_s26, 6 }
  0x33   : > { %s132_s3 = scalar_lea.sflag (!%p126_p3), [#allocation4], %s1450_s26  ;;  %s135_s4 = scalar_lea.vmem (!%p126_p3), [#allocation3], %s1110_s28 }
  0x39   : > { %1291 = dma.done.wait (%p1385_p8), %s132_s3, 1024  }
  0x3a   : > { %1293 = vsyncadd (%p1385_p8), %s132_s3, 4294966272  ;;  %v1113_v0 = vld [vmem:[%s135_s4 + $0x20] ss:$2 sm:$0xff]  ;;  %v1114_v2 = vld [vmem:[%s135_s4 + $0x30] ss:$2 sm:$0xff]  ;;  %vm292_vm0 = vcmask 64512  }
  0x3b   : > { %v157_v1 = vld [vmem:[%s135_s4] ss:$2 sm:$0xff]  ;;  %228 = vxpose.xlu1.b32.start.end [1/1] (short) (narrow) %v1113_v0, 16  ;;  %v1112_v3 = vld [vmem:[%s135_s4 + $0x10] ss:$2 sm:$0xff]  ;;  %s1111_s18 = sshll.u32 %s1450_s26, 7 }
  0x3c   : > { %164 = vxpose.xlu0.b32.start.end [1/1] (short) (narrow) %v157_v1, 16  ;;  %v1120_v4 = vld [vmem:[%s135_s4 + $0x11] ss:$2 sm:$0xff]  ;;  %v1119_v5 = vld [vmem:[%s135_s4 + $0x1] ss:$2 sm:$0xff]  ;;  %s1475_s27 = scalar_lea.vmem [#allocation6], %s1111_s18 }
  0x3d   : > { %v1122_v6 = vld [vmem:[%s135_s4 + $0x31] ss:$2 sm:$0xff]  ;;  %v1121_v7 = vld [vmem:[%s135_s4 + $0x21] ss:$2 sm:$0xff]  ;;  %s1140_s29 = sshll.u32 %s1312_s9, 11  ;;  %s1015_s30 = sshll.u32 %s1475_s27, 4  ;;  %s1514_s30 = int_to_ptr.vmem [resolvable:$true] %s1015_s30 }
  0x3e   : > { %s1512_s12 = scalar_lea.hbm %s1566_s1, %s1140_s29  ;;  %s1000_s9 = scalar_lea.sflag [#allocation5], %s1450_s26 }
  0x3f   : > { %s1238_s13 = scalar_lea.vmem %s1514_s30, 2048  ;;  %p1574_p9 = scmp.ne.s32.totalorder %s1570_s19, 0 }
  0x40   : > { %260 = vxpose.xlu1.b32.start.end [1/1] (short) (narrow) %v1114_v2, 16  ;;  %p1239_p8 = scmp.ne.s32.totalorder %s1514_s30, %s1238_s13  ;;  %s1325_s15 = smov [#allocation6]  }
  0x41   : > { %196 = vxpose.xlu0.b32.start.end [1/1] (short) (narrow) %v1112_v3, 16  ;;  %s1242_s16 = sshll.u32 %s1325_s15, 4  ;;  %s1243_s16 = int_to_ptr.vmem [resolvable:$false] %s1242_s16 }
  0x42   : > { %p1240_p11 = pnand %p1239_p8, %p1574_p9  ;;  %s1244_s17 = scalar_lea.vmem %s1243_s16, 4096 }
  0x43   : > { %p1245_p6 = scmp.lt.s32.totalorder %s1514_s30, %s1243_s16  ;;  %p1246_p13 = scmp.lt.s32.totalorder %s1244_s17, %s1238_s13 }
  0x44   : > { %p1241_p0 = pneg %p1240_p11 }
  0x45   : > { %621 = vxpose.xlu1.b32.start.end [1/1] (short) (narrow) %v1120_v4, 16  ;;  %p1247_p2 = por %p1246_p13, %p1245_p6 }
  0x46   : > { %589 = vxpose.xlu0.b32.start.end [1/1] (short) (narrow) %v1119_v5, 16 }
  0x47   : > { %p1248_p5 = pnand %p1247_p2, %p1241_p0 }
  0x4a   : > { %685 = vxpose.xlu1.b32.start.end [1/1] (short) (narrow) %v1122_v6, 16 }
  0x4b   : > { %653 = vxpose.xlu0.b32.start.end [1/1] (short) (narrow) %v1121_v7, 16 }
  0xbb   : > { %v244_v8 = vpop.trf.xlu1 }
  0xbc   : > { %v180_v9 = vpop.trf.xlu0  ;;  %297 = vst.msk [vmem:[#allocation2 + $0x20] sm:$0xff] %vm292_vm0, %v244_v8 }
  0xbd   : > { %293 = vst.msk [vmem:[#allocation2] sm:$0xff] %vm292_vm0, %v180_v9 }
  0xbf   : > { %v245_v10 = vpop.trf.xlu1 }
  0xc0   : > { %v181_v11 = vpop.trf.xlu0  ;;  %298 = vst.msk [vmem:[#allocation2 + $0x28] sm:$0xff] %vm292_vm0, %v245_v10 }
  0xc1   : > { %294 = vst.msk [vmem:[#allocation2 + $0x8] sm:$0xff] %vm292_vm0, %v181_v11 }
  0xc3   : > { %v276_v12 = vpop.trf.xlu1 }
  0xc4   : > { %v212_v13 = vpop.trf.xlu0  ;;  %299 = vst.msk [vmem:[#allocation2 + $0x30] sm:$0xff] %vm292_vm0, %v276_v12 }
  0xc5   : > { %295 = vst.msk [vmem:[#allocation2 + $0x10] sm:$0xff] %vm292_vm0, %v212_v13 }
  0xc7   : > { %v277_v14 = vpop.trf.xlu1  ;;  %v305_v19 = vld [vmem:[#allocation2 + $0x20] ss:$2 sm:$0xff]  ;;  %v445_v27 = vld [vmem:[#allocation2 + $0x21] ss:$2 sm:$0xff] }
  0xc8   : > { %v213_v15 = vpop.trf.xlu0  ;;  %v301_v16 = vld [vmem:[#allocation2] ss:$2 sm:$0xff]  ;;  %300 = vst.msk [vmem:[#allocation2 + $0x38] sm:$0xff] %vm292_vm0, %v277_v14  ;;  %v441_v20 = vld [vmem:[#allocation2 + $0x1] ss:$2 sm:$0xff] }
  0xc9   : > { %296 = vst.msk [vmem:[#allocation2 + $0x18] sm:$0xff] %vm292_vm0, %v213_v15  ;;  %308 = vxpose.xlu0.b32.start.end [1/1] (short) (narrow) %v301_v16, 8 }
  0xcb   : > { %v637_v17 = vpop.trf.xlu1 }
  0xcc   : > { %v605_v18 = vpop.trf.xlu0 }
  0xcd   : > { %372 = vxpose.xlu0.b32.start.end [1/1] (short) (narrow) %v305_v19, 8  ;;  %717 = vst.msk [vmem:[#allocation2] sm:$0xff] %vm292_vm0, %v605_v18 }
  0xcf   : > { %v638_v21 = vpop.trf.xlu1  ;;  %v307_v28 = vld [vmem:[#allocation2 + $0x30] ss:$2 sm:$0xff]  ;;  %v447_v29 = vld [vmem:[#allocation2 + $0x31] ss:$2 sm:$0xff] }
  0xd0   : > { %v606_v22 = vpop.trf.xlu0  ;;  %v303_v23 = vld [vmem:[#allocation2 + $0x10] ss:$2 sm:$0xff]  ;;  %v443_v24 = vld [vmem:[#allocation2 + $0x11] ss:$2 sm:$0xff] }
  0xd1   : > { %448 = vxpose.xlu0.b32.start.end [1/1] (short) (narrow) %v441_v20, 8  ;;  %718 = vst.msk [vmem:[#allocation2 + $0x8] sm:$0xff] %vm292_vm0, %v606_v22  ;;  %340 = vxpose.xlu1.b32.start.end [1/1] (short) (narrow) %v303_v23, 8  ;;  %719 = vst.msk [vmem:[#allocation2 + $0x10] sm:$0xff] %vm292_vm0, %v637_v17 }
  0xd2   : > { %720 = vst.msk [vmem:[#allocation2 + $0x18] sm:$0xff] %vm292_vm0, %v638_v21 }
  0xd3   : > { %v701_v25 = vpop.trf.xlu1 }
  0xd4   : > { %v669_v26 = vpop.trf.xlu0  ;;  %723 = vst.msk [vmem:[#allocation2 + $0x30] sm:$0xff] %vm292_vm0, %v701_v25 }
  0xd5   : > { %512 = vxpose.xlu0.b32.start.end [1/1] (short) (narrow) %v445_v27, 8  ;;  %721 = vst.msk [vmem:[#allocation2 + $0x20] sm:$0xff] %vm292_vm0, %v669_v26  ;;  %404 = vxpose.xlu1.b32.start.end [1/1] (short) (narrow) %v307_v28, 8 }
  0xd7   : > { %v702_v30 = vpop.trf.xlu1 }
  0xd8   : > { %v670_v31 = vpop.trf.xlu0  ;;  %v725_v32 = vld [vmem:[#allocation2] ss:$2 sm:$0xff]  ;;  %724 = vst.msk [vmem:[#allocation2 + $0x38] sm:$0xff] %vm292_vm0, %v702_v30  ;;  %v862_v36 = vld [vmem:[#allocation2 + $0x1] ss:$2 sm:$0xff] }
  0xd9   : > { %722 = vst.msk [vmem:[#allocation2 + $0x28] sm:$0xff] %vm292_vm0, %v670_v31  ;;  %480 = vxpose.xlu1.b32.start.end [1/1] (short) (narrow) %v443_v24, 8  ;;  %729 = vxpose.xlu0.b32.start.end [1/1] (short) (narrow) %v725_v32, 8  ;;  %v726_v33 = vld [vmem:[#allocation2 + $0x10] ss:$2 sm:$0xff] }
  0xda   : > { %v863_v37 = vld [vmem:[#allocation2 + $0x11] ss:$2 sm:$0xff] }
  0xdd   : > { %544 = vxpose.xlu1.b32.start.end [1/1] (short) (narrow) %v447_v29, 8 }
  0xdf   : > { %v728_v35 = vld [vmem:[#allocation2 + $0x30] ss:$2 sm:$0xff]  ;;  %v865_v39 = vld [vmem:[#allocation2 + $0x31] ss:$2 sm:$0xff] }
  0xe0   : > { %v727_v34 = vld [vmem:[#allocation2 + $0x20] ss:$2 sm:$0xff]  ;;  %v864_v38 = vld [vmem:[#allocation2 + $0x21] ss:$2 sm:$0xff] }
  0xe1   : > { %761 = vxpose.xlu1.b32.start.end [1/1] (short) (narrow) %v726_v33, 8  ;;  %793 = vxpose.xlu0.b32.start.end [1/1] (short) (narrow) %v727_v34, 8 }
  0xe5   : > { %825 = vxpose.xlu1.b32.start.end [1/1] (short) (narrow) %v728_v35, 8  ;;  %866 = vxpose.xlu0.b32.start.end [1/1] (short) (narrow) %v862_v36, 8 }
  0xe9   : > { %898 = vxpose.xlu1.b32.start.end [1/1] (short) (narrow) %v863_v37, 8  ;;  %930 = vxpose.xlu0.b32.start.end [1/1] (short) (narrow) %v864_v38, 8 }
  0xed   : > { %962 = vxpose.xlu1.b32.start.end [1/1] (short) (narrow) %v865_v39, 8 }
 0x149   : > { %v324_v40 = vpop.trf.xlu0 }
 0x14a   : > { %436 = vst.msk [vmem:[%s1475_s27] sm:$0xff] %vm292_vm0, %v324_v40 }
 0x14d   : > { %v388_v41 = vpop.trf.xlu0 }
 0x14e   : > { %438 = vst.msk [vmem:[%s1475_s27 + $0x40] sm:$0xff] %vm292_vm0, %v388_v41 }
 0x151   : > { %v356_v42 = vpop.trf.xlu1  ;;  %v464_v43 = vpop.trf.xlu0 }
 0x152   : > { %437 = vst.msk [vmem:[%s1475_s27 + $0x20] sm:$0xff] %vm292_vm0, %v356_v42  ;;  %1115 = vst.msk [vmem:[%s1475_s27 + $0x8] sm:$0xff] %vm292_vm0, %v464_v43 }
 0x155   : > { %v420_v44 = vpop.trf.xlu1  ;;  %v528_v45 = vpop.trf.xlu0 }
 0x156   : > { %439 = vst.msk [vmem:[%s1475_s27 + $0x60] sm:$0xff] %vm292_vm0, %v420_v44  ;;  %1117 = vst.msk [vmem:[%s1475_s27 + $0x48] sm:$0xff] %vm292_vm0, %v528_v45 }
 0x159   : > { %v496_v46 = vpop.trf.xlu1  ;;  %v745_v47 = vpop.trf.xlu0 }
 0x15a   : > { %1116 = vst.msk [vmem:[%s1475_s27 + $0x28] sm:$0xff] %vm292_vm0, %v496_v46  ;;  %1123 = vst.msk [vmem:[%s1475_s27 + $0x10] sm:$0xff] %vm292_vm0, %v745_v47 }
 0x15d   : > { %v560_v48 = vpop.trf.xlu1 }
 0x15e   : > { %1118 = vst.msk [vmem:[%s1475_s27 + $0x68] sm:$0xff] %vm292_vm0, %v560_v48 }
 0x161   : > { %v777_v49 = vpop.trf.xlu1  ;;  %v809_v50 = vpop.trf.xlu0 }
 0x162   : > { %1124 = vst.msk [vmem:[%s1475_s27 + $0x30] sm:$0xff] %vm292_vm0, %v777_v49  ;;  %1125 = vst.msk [vmem:[%s1475_s27 + $0x50] sm:$0xff] %vm292_vm0, %v809_v50 }
 0x165   : > { %v841_v51 = vpop.trf.xlu1  ;;  %v882_v52 = vpop.trf.xlu0 }
 0x166   : > { %1126 = vst.msk [vmem:[%s1475_s27 + $0x70] sm:$0xff] %vm292_vm0, %v841_v51  ;;  %1127 = vst.msk [vmem:[%s1475_s27 + $0x18] sm:$0xff] %vm292_vm0, %v882_v52 }
 0x169   : > { %v914_v53 = vpop.trf.xlu1  ;;  %v946_v54 = vpop.trf.xlu0 }
 0x16a   : > { %1128 = vst.msk [vmem:[%s1475_s27 + $0x38] sm:$0xff] %vm292_vm0, %v914_v53  ;;  %1129 = vst.msk [vmem:[%s1475_s27 + $0x58] sm:$0xff] %vm292_vm0, %v946_v54 }
 0x16d   : > { %v978_v55 = vpop.trf.xlu1 }
 0x16e   : > { %1130 = vst.msk [vmem:[%s1475_s27 + $0x78] sm:$0xff] %vm292_vm0, %v978_v55 }
 0x16f   : > { %1251 = shalt.err (!%p1248_p5)
}
 0x170   : > { %s1252_s22 = scalar_lea.hbm %s1512_s12, 2048  ;;  %s1256_s25 = scalar_lea.hbm %s1566_s1, 4096 }
 0x171   : > { %p1253_p4 = scmp.ne.s32.totalorder %s1512_s12, %s1252_s22  ;;  %p1257_p12 = scmp.lt.u32.totalorder %s1512_s12, %s1566_s1 }
 0x172   : > { %p1258_p1 = scmp.lt.u32.totalorder %s1256_s25, %s1252_s22  ;;  %p1260_p8 = scmp.lt.u32.totalorder %s1252_s22, %s1512_s12 }
 0x173   : > { %p1254_p7 = pnand %p1253_p4, %p1574_p9 }
 0x174   : > { %p1259_p3 = por %p1258_p1, %p1257_p12 }
 0x175   : > { %p1255_p10 = pneg %p1254_p7 }
 0x176   : > { %p1261_p11 = por %p1260_p8, %p1259_p3 }
 0x178   : > { %p1262_p0 = pnand %p1261_p11, %p1255_p10 }
 0x17a   : > { %1265 = shalt.err (!%p1262_p0)
}
 0x17b   : > { %s1326_s4 = smov 128   ;;  %s1327_s18 = smov 8  }
 0x17c   : > { %1143 = dma.vmem_to_hbm [thread:$0]  (%p1574_p9), %s1514_s30, 2048, %s1512_s12, %s1000_s9, %s1326_s4, %s1326_s4, %s1327_s18  }
 0x17d PF: > { %s1030_s27 = sand.u32 1, %s1300_s6   ;;  %p1575_p6 = scmp.ne.s32.totalorder %s1571_s21, 0 }
 0x17e   : > { %p1576_p13 = scmp.ge.s32.totalorder %s1320_s11, 2  ;;  %s1031_s29 = scalar_lea.sflag [#allocation5], %s1030_s27 }
 0x180   : > { %p1150_p2 = pnand %p1576_p13, %p1575_p6 }
 0x182   : > { %1295 = dma.done.wait (!%p1150_p2), %s1031_s29, 2048  }
 0x183   : > { %1297 = vsyncadd (!%p1150_p2), %s1031_s29, 4294965248  ;;  %s17_s11 = sadd.s32 1, %s1320_s11   ;;  %s1577_s6 = smov %s1304_s7 }
 0x184   : > { %p14_p5 = scmp.ge.s32.totalorder %s17_s11, 4   ;;  %s1578_s7 = smov %s1308_s8 }
 0x185   : > { %s1579_s8 = smov %s1394_s20  ;;  %s1580_s9 = smov %s1316_s10 }
 0x186   : > { %s1581_s10 = smov %s1583_s14  ;;  %16 = sbr.rel (!%p14_p5) target bundleno = 6 (0x6), region = 86 }
 0x18d   :  { %1036 = vsyncpa [#allocation4], 1 }
 0x18e   :  { %1038 = vsyncpa [#allocation4 + $0x1], 1 }
 0x18f   :  { %1039 = vsyncpa [#allocation5], 1 }
 0x190   :  { %1041 = vsyncpa [#allocation5 + $0x1], 1 }

</bundles_post_ra>
